<compile_context>
chip_gen: v7x
topology: tpu7x:2x2x1
jax: 0.10.0
libtpu: 0.0.40
codegen_flags: <defaults>
</compile_context>

<pallas_src>
import functools

import jax
import jax.numpy as jnp
from jax.experimental import pallas as pl
from jax.experimental.pallas import tpu as pltpu


def simple_nn_kernel(x_ref, w1_ref, b1_ref, w2_ref, b2_ref, o_ref, *, mxu_dtype=None):
    # x: [TB, D_in], w1: [D_in, H], b1: [1, H], w2: [H, 128], b2: [1, 128], o: [TB, C]
    x = x_ref[...]
    w1 = w1_ref[...]
    w2 = w2_ref[...]
    if mxu_dtype is not None:  # optional bf16 MXU inputs (v5e), f32 accumulate
        x, w1, w2 = x.astype(mxu_dtype), w1.astype(mxu_dtype), w2.astype(mxu_dtype)

    # i2h + ReLU (MXU matmul, f32 accumulate)
    h = jnp.dot(x, w1, preferred_element_type=jnp.float32) + b1_ref[...]
    h = jnp.maximum(h, jnp.float32(0.0))

    # dropout: identity in eval mode.
    # TODO(synk): training-mode dropout (random mask + 1/(1-p) scaling) not implemented.

    if mxu_dtype is not None:
        h = h.astype(mxu_dtype)

    # h2o on the 128-lane-padded class axis.  Padded bias lanes are -1e30 and the
    # padded w2 columns are 0, so padded logits are exactly -1e30 and contribute
    # exp(.) == 0 to the softmax denominator -- no in-kernel mask needed.
    logits = jnp.dot(h, w2, preferred_element_type=jnp.float32) + b2_ref[...]

    # numerically stable log_softmax over the (padded) class axis
    m = jnp.max(logits, axis=-1, keepdims=True)
    lse = jnp.log(jnp.sum(jnp.exp(logits - m), axis=-1, keepdims=True)) + m

    # store only the real classes (tiny lane-masked store; no 128-wide writeback)
    c = o_ref.shape[-1]
    o_ref[...] = (logits[:, :c] - lse).astype(o_ref.dtype)


def _round_up(n, m):
    return ((n + m - 1) // m) * m


def _is_dual_tc():
    """v7x-like parts: 64 MiB VMEM per TensorCore, 2 TCs/chip. v5e/v6e: 128 MiB, 1 TC."""
    try:
        vmem_cap = int(pltpu.get_tpu_info().vmem_capacity_bytes)
    except Exception:
        vmem_cap = 64 * 1024 * 1024  # conservative fallback
    return vmem_cap <= 64 * 1024 * 1024


def simple_nn_forward(x, w1_t, b1, w2_t, b2, *, batch_tile=4096, mxu_dtype=None):
    """x: [B, D_in] f32. Weights pre-transposed: w1_t [D_in, H], w2_t [H, C]."""
    B, D_in = x.shape
    H = w1_t.shape[1]
    C = w2_t.shape[1]
    C_PAD = 128  # lane-dense class axis for the second matmul / lane reductions

    # One-time class-axis padding; mask folded into the bias.
    w2_p = jnp.zeros((H, C_PAD), w2_t.dtype).at[:, :C].set(w2_t)
    b2_p = jnp.full((1, C_PAD), -1e30, b2.dtype).at[:, :C].set(b2)

    kernel = functools.partial(simple_nn_kernel, mxu_dtype=mxu_dtype)
    out_shape = jax.ShapeDtypeStruct((B, C), jnp.float32)

    # Tile selection: as few grid steps as possible (kernel is DMA/overhead bound).
    # On dual-TC parts, big batches keep an even number (>=2) of steps so the
    # "parallel" batch axis shards across both TensorCores.
    b8 = _round_up(B, 8)
    tb = max(8, min(batch_tile, b8))
    nsteps = pl.cdiv(b8, tb)
    if _is_dual_tc() and b8 >= 1024:
        nsteps = max(nsteps, 2)
        nsteps += nsteps % 2                      # even step count -> balanced 2-TC split
        tb = _round_up(pl.cdiv(b8, nsteps), 8)
        nsteps = pl.cdiv(b8, tb)

    if nsteps == 1:
        # Grid-less call: whole arrays as single VMEM blocks, no pipeline overhead.
        out = pl.pallas_call(kernel, out_shape=out_shape)(x, w1_t, b1, w2_p, b2_p)
    else:
        # Batched: x/out stream as (tb, .) tiles; tiny weights stay VMEM-resident via
        # constant index_maps.  Ragged last tile handled by Pallas (no jnp.pad).
        out = pl.pallas_call(
            kernel,
            out_shape=out_shape,
            grid=(nsteps,),
            in_specs=[
                pl.BlockSpec((tb, D_in), lambda i: (i, 0)),   # x tile streams
                pl.BlockSpec((D_in, H), lambda i: (0, 0)),    # resident weights
                pl.BlockSpec((1, H), lambda i: (0, 0)),
                pl.BlockSpec((H, C_PAD), lambda i: (0, 0)),
                pl.BlockSpec((1, C_PAD), lambda i: (0, 0)),
            ],
            out_specs=pl.BlockSpec((tb, C), lambda i: (i, 0)),
            compiler_params=pltpu.CompilerParams(
                dimension_semantics=("parallel",),
            ),
        )(x, w1_t, b1, w2_p, b2_p)

    return out


def init_params(key, input_size, hidden_size, num_classes=2):
    """Deterministic PyTorch-style Linear init: U(-1/sqrt(fan_in), 1/sqrt(fan_in))."""
    k1, k2, k3, k4 = jax.random.split(key, 4)
    bound1 = 1.0 / (input_size ** 0.5)
    bound2 = 1.0 / (hidden_size ** 0.5)
    # Stored pre-transposed relative to torch's [out, in] layout.
    w1_t = jax.random.uniform(k1, (input_size, hidden_size), jnp.float32,
                              minval=-bound1, maxval=bound1)
    b1 = jax.random.uniform(k2, (1, hidden_size), jnp.float32,
                            minval=-bound1, maxval=bound1)
    w2_t = jax.random.uniform(k3, (hidden_size, num_classes), jnp.float32,
                              minval=-bound2, maxval=bound2)
    b2 = jax.random.uniform(k4, (1, num_classes), jnp.float32,
                            minval=-bound2, maxval=bound2)
    return w1_t, b1, w2_t, b2


if __name__ == "__main__":
    input_size = 32
    hidden_size = 32

    key = jax.random.PRNGKey(0)
    kp, kx_small, kx_big = jax.random.split(key, 3)
    w1_t, b1, w2_t, b2 = init_params(kp, input_size, hidden_size)

    def ref(xv):
        h = jnp.maximum(xv @ w1_t + b1, 0.0)
        return jax.nn.log_softmax(h @ w2_t + b2, axis=-1)

    # Small batch: exercises the grid-less single-shot path.
    x_small = jax.random.normal(kx_small, (8, input_size), jnp.float32)
    out_small = jax.block_until_ready(simple_nn_forward(x_small, w1_t, b1, w2_t, b2))
    assert out_small.shape == (8, 2)
    assert jnp.allclose(out_small, ref(x_small), atol=1e-5, rtol=1e-5)

    # Larger ragged batch: forces >=2 large grid steps (resident weights, parallel
    # batch axis, ragged last tile handled inside Pallas).
    x_big = jax.random.normal(kx_big, (4000, input_size), jnp.float32)
    out_big = jax.block_until_ready(
        simple_nn_forward(x_big, w1_t, b1, w2_t, b2, batch_tile=2048))
    assert out_big.shape == (4000, 2)
    assert jnp.allclose(out_big, ref(x_big), atol=1e-5, rtol=1e-5)

    print("KERNEL_OK")
</pallas_src>

<mosaic_0001>
module attributes {stable_mosaic.version = 11 : i64} {
  func.func @simple_nn_kernel(%arg0: memref<8x32xf32, #tpu.memory_space<vmem>>, %arg1: memref<32x32xf32, #tpu.memory_space<vmem>>, %arg2: memref<1x32xf32, #tpu.memory_space<vmem>>, %arg3: memref<32x128xf32, #tpu.memory_space<vmem>>, %arg4: memref<1x128xf32, #tpu.memory_space<vmem>>, %arg5: memref<8x2xf32, #tpu.memory_space<vmem>>) attributes {dimension_semantics = [], scalar_prefetch = 0 : i64, scratch_operands = 0 : i64, tpu.core_type = #tpu.core_type<tc>} {
    %c0 = arith.constant 0 : index
    %c0_0 = arith.constant 0 : index
    %0 = vector.load %arg0[%c0, %c0_0] : memref<8x32xf32, #tpu.memory_space<vmem>>, vector<8x32xf32>
    %c0_1 = arith.constant 0 : index
    %c0_2 = arith.constant 0 : index
    %1 = vector.load %arg1[%c0_1, %c0_2] : memref<32x32xf32, #tpu.memory_space<vmem>>, vector<32x32xf32>
    %c0_3 = arith.constant 0 : index
    %c0_4 = arith.constant 0 : index
    %2 = vector.load %arg3[%c0_3, %c0_4] : memref<32x128xf32, #tpu.memory_space<vmem>>, vector<32x128xf32>
    %cst = arith.constant dense<0.000000e+00> : vector<8x32xf32>
    %3 = tpu.matmul %0, %1, %cst {dimension_numbers = #tpu.dot_dimension_numbers<[1], [0], [0], [1], [0, 0, 1, 1], [], []>} : vector<8x32xf32>, vector<32x32xf32>, vector<8x32xf32> -> vector<8x32xf32>
    %c0_5 = arith.constant 0 : index
    %c0_6 = arith.constant 0 : index
    %4 = vector.load %arg2[%c0_5, %c0_6] : memref<1x32xf32, #tpu.memory_space<vmem>>, vector<1x32xf32>
    %5 = vector.broadcast %4 : vector<1x32xf32> to vector<8x32xf32>
    %6 = arith.addf %3, %5 : vector<8x32xf32>
    %cst_7 = arith.constant 0.000000e+00 : f32
    %7 = vector.broadcast %cst_7 : f32 to vector<8x32xf32>
    %8 = arith.maximumf %6, %7 : vector<8x32xf32>
    %cst_8 = arith.constant dense<0.000000e+00> : vector<8x128xf32>
    %9 = tpu.matmul %8, %2, %cst_8 {dimension_numbers = #tpu.dot_dimension_numbers<[1], [0], [0], [1], [0, 0, 1, 1], [], []>} : vector<8x32xf32>, vector<32x128xf32>, vector<8x128xf32> -> vector<8x128xf32>
    %c0_9 = arith.constant 0 : index
    %c0_10 = arith.constant 0 : index
    %10 = vector.load %arg4[%c0_9, %c0_10] : memref<1x128xf32, #tpu.memory_space<vmem>>, vector<1x128xf32>
    %11 = vector.broadcast %10 : vector<1x128xf32> to vector<8x128xf32>
    %12 = arith.addf %9, %11 : vector<8x128xf32>
    %cst_11 = arith.constant dense<0xFF800000> : vector<8xf32>
    %13 = vector.multi_reduction <maximumf>, %12, %cst_11 [1] : vector<8x128xf32> to vector<8xf32>
    %14 = vector.shape_cast %13 : vector<8xf32> to vector<8x1xf32>
    %15 = vector.broadcast %14 : vector<8x1xf32> to vector<8x128xf32>
    %16 = arith.subf %12, %15 : vector<8x128xf32>
    %17 = math.exp %16 : vector<8x128xf32>
    %cst_12 = arith.constant dense<0.000000e+00> : vector<8xf32>
    %18 = vector.multi_reduction <add>, %17, %cst_12 [1] : vector<8x128xf32> to vector<8xf32>
    %19 = vector.shape_cast %18 : vector<8xf32> to vector<8x1xf32>
    %20 = math.log %19 : vector<8x1xf32>
    %21 = arith.addf %20, %14 : vector<8x1xf32>
    %22 = vector.extract_strided_slice %12 {offsets = [0, 0], sizes = [8, 2], strides = [1, 1]} : vector<8x128xf32> to vector<8x2xf32>
    %23 = vector.broadcast %21 : vector<8x1xf32> to vector<8x2xf32>
    %24 = arith.subf %22, %23 : vector<8x2xf32>
    %c0_13 = arith.constant 0 : index
    %c0_14 = arith.constant 0 : index
    %25 = vector.load %arg5[%c0_13, %c0_14] : memref<8x2xf32, #tpu.memory_space<vmem>>, vector<8x2xf32>
    tpu.vector_store %arg5[%c0_13, %c0_14], %24 {strides = array<i32>} : memref<8x2xf32, #tpu.memory_space<vmem>>, vector<8x2xf32>,
    return
  }
}

</mosaic_0001>

<bundles_post_ra>
// kernel: tpu_custom_call.1
= control target key start
LH: loop header
LB: loop body
LE: loop exit
PB: predicated region body
PF: predicated region fallthrough
CT: control target
= control target key end

     0   :  { %10 = vsyncpa [#allocation3], 0  ;;  %s468_s0 = inlined_call_operand.hbm [shape: f32[8,32], index: 0, kind: input, shape index: {}]   ;;  %s469_s1 = inlined_call_operand.hbm [shape: f32[32,32], index: 1, kind: input, shape index: {}]   ;;  %s470_s2 = inlined_call_operand.vmem [shape: f32[1,32], index: 2, kind: input, shape index: {}]   ;;  %s471_s3 = inlined_call_operand.hbm [shape: f32[32,128], index: 3, kind: input, shape index: {}]   ;;  %s472_s4 = inlined_call_operand.vmem [shape: f32[1,128], index: 4, kind: input, shape index: {}]   ;;  %s473_s5 = inlined_call_operand.vmem [shape: f32[8,2], index: 5, kind: output, shape index: {}]  }
   0x1   :  { %11 = vsyncpa [#allocation5], 0  ;;  %s379_s18 = smov [#allocation4]   ;;  %s309_s22 = scalar_lea.hbm %s469_s1, 512 }
   0x2   :  { %s27_s19 = sshll.u32 %s379_s18, 4  ;;  %p310_p0 = scmp.ne.s32.totalorder %s469_s1, %s309_s22  ;;  %s28_s19 = int_to_ptr.vmem [resolvable:$true] %s27_s19 }
   0x3   :  { %p313_p1 = scmp.lt.u32.totalorder %s309_s22, %s469_s1 }
   0x5   :  { %p315_p2 = pnand %p313_p1, %p310_p0 }
   0x7   :  { %318 = shalt.err (!%p315_p2)
}
   0x8   :  { %s319_s27 = scalar_lea.vmem %s28_s19, 512  ;;  %p324_p4 = scmp.lt.s32.totalorder %s28_s19, %s28_s19 }
   0x9   :  { %p320_p3 = scmp.ne.s32.totalorder %s28_s19, %s319_s27  ;;  %p325_p5 = scmp.lt.s32.totalorder %s319_s27, %s319_s27 }
   0xb   :  { %p326_p6 = por %p325_p5, %p324_p4 }
   0xd   :  { %p327_p7 = pnand %p326_p6, %p320_p3 }
   0xf   :  { %330 = shalt.err (!%p327_p7)
}
  0x10   :  { %s380_s28 = smov 128   ;;  %s381_s29 = smov 8  }
  0x11   :  { %33 = dma.hbm_to_vmem [thread:$0]  %s469_s1, 512, %s28_s19, [#allocation5], %s380_s28, %s380_s28, %s381_s29  }
  0x12   :  { %s382_s7 = smov [#allocation2]   ;;  %s383_s9 = smov [#allocation6]  }
  0x13   :  { %s18_s8 = sshll.u32 %s382_s7, 4  ;;  %s41_s10 = sshll.u32 %s383_s9, 4  ;;  %s19_s8 = int_to_ptr.vmem [resolvable:$true] %s18_s8  ;;  %s42_s10 = int_to_ptr.vmem [resolvable:$true] %s41_s10 }
  0x14   :  { %s331_s13 = scalar_lea.hbm %s468_s0, 128 }
  0x15   :  { %p332_p8 = scmp.ne.s32.totalorder %s468_s0, %s331_s13  ;;  %p335_p9 = scmp.lt.u32.totalorder %s331_s13, %s468_s0 }
  0x17   :  { %p337_p10 = pnand %p335_p9, %p332_p8 }
  0x19   :  { %340 = shalt.err (!%p337_p10)
}
  0x1a   :  { %s341_s1 = scalar_lea.vmem %s19_s8, 128  ;;  %p346_p12 = scmp.lt.s32.totalorder %s19_s8, %s19_s8 }
  0x1b   :  { %p342_p11 = scmp.ne.s32.totalorder %s19_s8, %s341_s1  ;;  %p347_p13 = scmp.lt.s32.totalorder %s341_s1, %s341_s1 }
  0x1d   :  { %p348_p0 = por %p347_p13, %p346_p12 }
  0x1f   :  { %p349_p1 = pnand %p348_p0, %p342_p11 }
  0x21   :  { %352 = shalt.err (!%p349_p1)
}
  0x22   :  { %21 = dma.hbm_to_vmem [thread:$0]  %s468_s0, 128, %s19_s8, [#allocation3]  }
  0x23   :  { %s353_s22 = scalar_lea.hbm %s471_s3, 512 }
  0x24   :  { %p354_p2 = scmp.ne.s32.totalorder %s471_s3, %s353_s22  ;;  %p357_p3 = scmp.lt.u32.totalorder %s353_s22, %s471_s3 }
  0x26   :  { %p359_p4 = pnand %p357_p3, %p354_p2 }
  0x28   :  { %362 = shalt.err (!%p359_p4)
}
  0x29   :  { %s363_s27 = scalar_lea.vmem %s42_s10, 512  ;;  %p368_p6 = scmp.lt.s32.totalorder %s42_s10, %s42_s10 }
  0x2a   :  { %p364_p5 = scmp.ne.s32.totalorder %s42_s10, %s363_s27  ;;  %p369_p7 = scmp.lt.s32.totalorder %s363_s27, %s363_s27 }
  0x2c   :  { %p370_p8 = por %p369_p7, %p368_p6 }
  0x2e   :  { %p371_p9 = pnand %p370_p8, %p364_p5 }
  0x30   :  { %374 = shalt.err (!%p371_p9)
}
  0x31   :  { %47 = dma.hbm_to_vmem [thread:$0]  %s471_s3, 512, %s42_s10, [#allocation5], %s380_s28, %s380_s28, %s381_s29  }
  0x32   :  { %375 = dma.done.wait [#allocation3], 128  }
  0x33   :  { %376 = vsyncadd [#allocation3], 4294967168 }
  0x34   :  { %377 = dma.done.wait [#allocation5], 1024  }
  0x35   :  { %378 = vsyncadd [#allocation5], 4294966272  ;;  %v384_v0 = vmov 0.0|0.0   ;;  %vm385_vm0 = vmmov 0   ;;  %v386_v1 = vmov 0.0   ;;  %v60_v2 = vld [vmem:[#allocation4] sm:$0xff] }
  0x36   :  { %285 = vmatprep.subr.bf16.mxu0 %v384_v0  ;;  %271 = vmatprep.mubr.msk.f32.mxu0 %vm385_vm0, %v386_v1  ;;  %v61_v3 = vld [vmem:[#allocation4 + $0x8] sm:$0xff]  ;;  %v62_v4 = vld [vmem:[#allocation4 + $0x10] sm:$0xff]  ;;  %v63_v6 = vld [vmem:[#allocation4 + $0x18] sm:$0xff]  ;;  %vm75_vm1 = vcmask 261120   ;;  %vm241_vm2 = vcmask 15360  }
  0x37   :  { %291 = vmatprep.subr.bf16.mxu1 %v384_v0  ;;  %282 = vmatprep.mubr.msk.f32.mxu1 %vm385_vm0, %v386_v1  ;;  %v286_v5 = vpack.c.bf16 %v61_v3, %v60_v2  ;;  %v64_v7 = vld [vmem:[#allocation6] sm:$0xff]  ;;  %v65_v8 = vld [vmem:[#allocation6 + $0x8] sm:$0xff]  ;;  %v289_v9 = vpack.c.bf16 %v63_v6, %v62_v4  ;;  %v59_v11 = vld [vmem:[#allocation2] sm:$0xff] }
  0x38   :  { %v292_v10 = vpack.c.bf16 %v65_v8, %v64_v7  ;;  %v66_v12 = vld [vmem:[#allocation6 + $0x10] sm:$0xff]  ;;  %v67_v13 = vld [vmem:[#allocation6 + $0x18] sm:$0xff] }
  0x39   :  { %287 = vmatpush3.bf16.msra.mxu0 %v286_v5  ;;  %v295_v14 = vpack.c.bf16 %v67_v13, %v66_v12  ;;  %v249_v15 = vld [vmem:[%s470_s2] ss:$0 sm:$0xff] }
  0x3a   :  { %288 = vmatprep.subr.bf16.mxu0 %v384_v0  ;;  %293 = vmatpush3.bf16.msra.mxu1 %v292_v10  ;;  %v251_v20 = vld [vmem:[%s472_s4] ss:$0 sm:$0xff] }
  0x3b   :  { %294 = vmatprep.subr.bf16.mxu1 %v384_v0 }
  0x3d   :  { %290 = vmatpush3.bf16.msra.mxu0 %v289_v9 }
  0x3e   :  { %296 = vmatpush3.bf16.msra.mxu1 %v295_v14 }
  0x40   :  { %272 = vmatmul.mubr.msk.f32.vlgmr.msra.gmra.mrb[0].mxu0 %vm75_vm1, %v59_v11 }
 0x113   :  { %v145_v16 = vpop.f32.mrb[0].mxu0 }
 0x114   :  { %v146_v17 = vadd.f32 %v249_v15, %v145_v16  ;;  %v273_v18 = vpop.f32.mrb[1].mxu0 }
 0x116   :  { %v149_v19 = vmax.f32 %v146_v17, 0.0 }
 0x118   :  { %283 = vmatmul.mubr.msk.f32.vlgmr.msra.gmra.mrb[0].mxu1 %vm75_vm1, %v149_v19 }
 0x1eb   :  { %v226_v21 = vpop.f32.mrb[0].mxu1 }
 0x1ec   :  { %v227_v22 = vadd.f32 %v251_v20, %v226_v21  ;;  %v284_v23 = vpop.f32.mrb[1].mxu1 }
 0x1ee   :  { %230 = vmax.xlane.f32.xlu0 %v227_v22 }
 0x27b   :  { %v231_v24 = vpop.xlane.xlu0 %230 }
 0x27c   :  { %v232_v25 = vsub.f32 %v227_v22, %v231_v24 }
 0x27e   :  { %v233_v26 = vmul.f32 1.442695, %v232_v25 }
 0x280   :  { %305 = vpow2.f32 %v233_v26 }
 0x28a   :  { %v306_v27 = vpop.eup %305 }
 0x28b   :  { %235 = vadd.xlane.f32.xlu0 %v306_v27 }
 0x318   :  { %v236_v28 = vpop.xlane.xlu0 %235 }
 0x319   :  { %307 = vlog2.f32 %v236_v28 }
 0x323   :  { %v308_v29 = vpop.eup %307 }
 0x324   :  { %v238_v30 = vmul.f32 0.6931472, %v308_v29 }
 0x326   :  { %v239_v31 = vadd.f32 %v238_v30, %v231_v24 }
 0x328   :  { %v240_v32 = vsub.f32 %v227_v22, %v239_v31 }
 0x32a   :  { %242 = vst.msk [vmem:[%s473_s5] sm:$0xff] %vm241_vm2, %v240_v32 }
 0x32b   :  { %247 = vsyncpa [#allocation3], 1 }
 0x32c   :  { %248 = vsyncpa [#allocation5], 1 }

</bundles_post_ra>
